<compile_context>
chip_gen: v7x
topology: tpu7x:2x2x1
jax: 0.10.0
libtpu: 0.0.40
codegen_flags: <defaults>
</compile_context>

<pallas_src>
import functools

import jax
import jax.numpy as jnp
from jax.experimental import pallas as pl
from jax.experimental.pallas import tpu as pltpu


def policy_kernel(x_ref, w1_ref, b1_ref,
                  w_heads_ref, b_heads_ref,
                  wvh_ref, bvh_ref,
                  prob_ref, value_ref,
                  *, hidden, action_dim):
    # Shared layer: (B, obs) @ (obs, H) + (1, H) -> relu   (no transpose: W is (in, out))
    shared = jnp.dot(x_ref[...], w1_ref[...],
                     preferred_element_type=jnp.float32) + b1_ref[...]
    shared = jnp.maximum(shared, 0.0)

    # Fused heads: one (B, H) @ (H, H + A) matmul.
    # Columns [0:H)    -> value hidden (lane-aligned slice)
    # Columns [H:H+A)  -> policy logits (starts on a lane boundary)
    heads = jnp.dot(shared, w_heads_ref[...],
                    preferred_element_type=jnp.float32) + b_heads_ref[...]
    v_hidden = heads[:, :hidden]
    scores = heads[:, hidden:hidden + action_dim]

    # Softmax over the action axis (exact reciprocal keeps f32 1e-5 accuracy).
    scores = scores - jnp.max(scores, axis=1, keepdims=True)
    exp_scores = jnp.exp(scores)
    denom = jnp.sum(exp_scores, axis=1, keepdims=True)
    prob_ref[...] = exp_scores * pl.reciprocal(denom, approx=False)

    # Value head as VPU multiply + cross-lane reduce (avoids an N=1 MXU pass).
    # wvh_ref is the (1, H) torch weight row; bvh is an SMEM scalar.
    value_ref[...] = (jnp.sum(v_hidden * wvh_ref[...], axis=1, keepdims=True)
                      + bvh_ref[0, 0])


@jax.jit
def policy_forward(state, params):
    """state: (B, obs_dim) float32.  Returns (action_prob (B, A), state_value (B, 1))."""
    w1, b1, w2p, b2p, w2v, b2v, wvh, bvh = params  # torch-layout (out, in) weights
    B = state.shape[0]
    H = w1.shape[0]
    A = w2p.shape[0]

    # Pre-transpose / fuse weights once in the wrapper (outside the kernel):
    #   w1_t    : (obs, H)
    #   w_heads : (H, H + A)  = [ w2v.T | w2p.T ]   (value columns first -> aligned slices)
    #   b_heads : (1, H + A)  = [ b2v   | b2p   ]
    w1_t = w1.T
    w_heads = jnp.concatenate([w2v.T, w2p.T], axis=1)
    b_heads = jnp.concatenate([b2v, b2p], axis=1)
    bvh_s = bvh.reshape(1, 1)  # scalar bias -> SMEM

    vmem = pl.BlockSpec(memory_space=pltpu.MemorySpace.VMEM)
    smem = pl.BlockSpec(memory_space=pltpu.MemorySpace.SMEM)

    kernel = functools.partial(policy_kernel, hidden=H, action_dim=A)

    return pl.pallas_call(
        kernel,
        out_shape=(
            jax.ShapeDtypeStruct((B, A), jnp.float32),
            jax.ShapeDtypeStruct((B, 1), jnp.float32),
        ),
        in_specs=[vmem, vmem, vmem, vmem, vmem, vmem, smem],
        out_specs=(vmem, vmem),
    )(state, w1_t, b1, w_heads, b_heads, wvh, bvh_s)


def init_params(key, obs_dim, action_dim, hidden):
    """Deterministic init mimicking nn.Linear default U(-1/sqrt(fan_in), 1/sqrt(fan_in))."""
    def linear(key, out_f, in_f):
        kw, kb = jax.random.split(key)
        bound = 1.0 / jnp.sqrt(jnp.float32(in_f))
        w = jax.random.uniform(kw, (out_f, in_f), jnp.float32, -bound, bound)
        b = jax.random.uniform(kb, (1, out_f), jnp.float32, -bound, bound)
        return w, b

    k1, k2, k3, k4 = jax.random.split(key, 4)
    w1, b1 = linear(k1, hidden, obs_dim)        # linear1_for_shared
    w2p, b2p = linear(k2, action_dim, hidden)   # linear2_for_policy
    w2v, b2v = linear(k3, hidden, hidden)       # linear2_for_value
    wvh, bvh = linear(k4, 1, hidden)            # valuehead
    return (w1, b1, w2p, b2p, w2v, b2v, wvh, bvh)


def reference_forward(state, params):
    w1, b1, w2p, b2p, w2v, b2v, wvh, bvh = params
    shared = jnp.maximum(state @ w1.T + b1, 0.0)
    probs = jax.nn.softmax(shared @ w2p.T + b2p, axis=1)
    value = (shared @ w2v.T + b2v) @ wvh.T + bvh
    return probs, value


if __name__ == "__main__":
    key = jax.random.PRNGKey(0)

    # CartPole-like env: observation_dim=4, discrete action_dim=2, hidden=128.
    B, OBS, ACT, HID = 2, 4, 2, 128

    k_params, k_state = jax.random.split(key)
    params = init_params(k_params, OBS, ACT, HID)
    state = jax.random.normal(k_state, (B, OBS), jnp.float32)

    action_prob, state_value = policy_forward(state, params)
    jax.block_until_ready((action_prob, state_value))

    # Sanity check against a pure-JAX reference.
    ref_prob, ref_value = reference_forward(state, params)
    assert action_prob.shape == (B, ACT)
    assert state_value.shape == (B, 1)
    assert jnp.allclose(action_prob, ref_prob, atol=1e-5, rtol=1e-5)
    assert jnp.allclose(state_value, ref_value, atol=1e-5, rtol=1e-5)
    assert jnp.allclose(jnp.sum(action_prob, axis=1), 1.0, atol=1e-5)

    print("KERNEL_OK")
</pallas_src>

<mosaic_0001>
module attributes {stable_mosaic.version = 11 : i64} {
  func.func @policy_kernel(%arg0: memref<2x4xf32, #tpu.memory_space<vmem>>, %arg1: memref<4x128xf32, #tpu.memory_space<vmem>>, %arg2: memref<1x128xf32, #tpu.memory_space<vmem>>, %arg3: memref<128x130xf32, #tpu.memory_space<vmem>>, %arg4: memref<1x130xf32, #tpu.memory_space<vmem>>, %arg5: memref<1x128xf32, #tpu.memory_space<vmem>>, %arg6: memref<1x1xf32, #tpu.memory_space<smem>>, %arg7: memref<2x2xf32, #tpu.memory_space<vmem>>, %arg8: memref<2x1xf32, #tpu.memory_space<vmem>>) attributes {dimension_semantics = [], scalar_prefetch = 0 : i64, scratch_operands = 0 : i64, tpu.core_type = #tpu.core_type<tc>} {
    %c0 = arith.constant 0 : index
    %c0_0 = arith.constant 0 : index
    %0 = vector.load %arg0[%c0, %c0_0] : memref<2x4xf32, #tpu.memory_space<vmem>>, vector<2x4xf32>
    %c0_1 = arith.constant 0 : index
    %c0_2 = arith.constant 0 : index
    %1 = vector.load %arg1[%c0_1, %c0_2] : memref<4x128xf32, #tpu.memory_space<vmem>>, vector<4x128xf32>
    %cst = arith.constant dense<0.000000e+00> : vector<2x128xf32>
    %2 = tpu.matmul %0, %1, %cst {dimension_numbers = #tpu.dot_dimension_numbers<[1], [0], [0], [1], [0, 0, 1, 1], [], []>} : vector<2x4xf32>, vector<4x128xf32>, vector<2x128xf32> -> vector<2x128xf32>
    %c0_3 = arith.constant 0 : index
    %c0_4 = arith.constant 0 : index
    %3 = vector.load %arg2[%c0_3, %c0_4] : memref<1x128xf32, #tpu.memory_space<vmem>>, vector<1x128xf32>
    %4 = vector.broadcast %3 : vector<1x128xf32> to vector<2x128xf32>
    %5 = arith.addf %2, %4 : vector<2x128xf32>
    %cst_5 = arith.constant 0.000000e+00 : f32
    %6 = vector.broadcast %cst_5 : f32 to vector<2x128xf32>
    %7 = arith.maximumf %5, %6 : vector<2x128xf32>
    %c0_6 = arith.constant 0 : index
    %c0_7 = arith.constant 0 : index
    %8 = vector.load %arg3[%c0_6, %c0_7] : memref<128x130xf32, #tpu.memory_space<vmem>>, vector<128x130xf32>
    %cst_8 = arith.constant dense<0.000000e+00> : vector<2x130xf32>
    %9 = tpu.matmul %7, %8, %cst_8 {dimension_numbers = #tpu.dot_dimension_numbers<[1], [0], [0], [1], [0, 0, 1, 1], [], []>} : vector<2x128xf32>, vector<128x130xf32>, vector<2x130xf32> -> vector<2x130xf32>
    %c0_9 = arith.constant 0 : index
    %c0_10 = arith.constant 0 : index
    %10 = vector.load %arg4[%c0_9, %c0_10] : memref<1x130xf32, #tpu.memory_space<vmem>>, vector<1x130xf32>
    %11 = vector.broadcast %10 : vector<1x130xf32> to vector<2x130xf32>
    %12 = arith.addf %9, %11 : vector<2x130xf32>
    %13 = vector.extract_strided_slice %12 {offsets = [0, 0], sizes = [2, 128], strides = [1, 1]} : vector<2x130xf32> to vector<2x128xf32>
    %14 = vector.extract_strided_slice %12 {offsets = [0, 128], sizes = [2, 2], strides = [1, 1]} : vector<2x130xf32> to vector<2x2xf32>
    %cst_11 = arith.constant dense<0xFF800000> : vector<2xf32>
    %15 = vector.multi_reduction <maximumf>, %14, %cst_11 [1] : vector<2x2xf32> to vector<2xf32>
    %16 = vector.shape_cast %15 : vector<2xf32> to vector<2x1xf32>
    %17 = vector.broadcast %16 : vector<2x1xf32> to vector<2x2xf32>
    %18 = arith.subf %14, %17 : vector<2x2xf32>
    %19 = math.exp %18 : vector<2x2xf32>
    %cst_12 = arith.constant dense<0.000000e+00> : vector<2xf32>
    %20 = vector.multi_reduction <add>, %19, %cst_12 [1] : vector<2x2xf32> to vector<2xf32>
    %21 = vector.shape_cast %20 : vector<2xf32> to vector<2x1xf32>
    %22 = tpu.reciprocal %21 : vector<2x1xf32> -> vector<2x1xf32>
    %23 = vector.broadcast %22 : vector<2x1xf32> to vector<2x2xf32>
    %24 = arith.mulf %19, %23 : vector<2x2xf32>
    %c0_13 = arith.constant 0 : index
    %c0_14 = arith.constant 0 : index
    %25 = vector.load %arg7[%c0_13, %c0_14] : memref<2x2xf32, #tpu.memory_space<vmem>>, vector<2x2xf32>
    tpu.vector_store %arg7[%c0_13, %c0_14], %24 {strides = array<i32>} : memref<2x2xf32, #tpu.memory_space<vmem>>, vector<2x2xf32>,
    %c0_15 = arith.constant 0 : index
    %c0_16 = arith.constant 0 : index
    %26 = vector.load %arg5[%c0_15, %c0_16] : memref<1x128xf32, #tpu.memory_space<vmem>>, vector<1x128xf32>
    %27 = vector.broadcast %26 : vector<1x128xf32> to vector<2x128xf32>
    %28 = arith.mulf %13, %27 : vector<2x128xf32>
    %cst_17 = arith.constant dense<0.000000e+00> : vector<2xf32>
    %29 = vector.multi_reduction <add>, %28, %cst_17 [1] : vector<2x128xf32> to vector<2xf32>
    %30 = vector.shape_cast %29 : vector<2xf32> to vector<2x1xf32>
    %c0_18 = arith.constant 0 : index
    %c0_19 = arith.constant 0 : index
    %31 = memref.load %arg6[%c0_18, %c0_19] : memref<1x1xf32, #tpu.memory_space<smem>>
    %32 = vector.broadcast %31 : f32 to vector<2x1xf32>
    %33 = arith.addf %30, %32 : vector<2x1xf32>
    %c0_20 = arith.constant 0 : index
    %c0_21 = arith.constant 0 : index
    %34 = vector.load %arg8[%c0_20, %c0_21] : memref<2x1xf32, #tpu.memory_space<vmem>>, vector<2x1xf32>
    tpu.vector_store %arg8[%c0_20, %c0_21], %33 {strides = array<i32>} : memref<2x1xf32, #tpu.memory_space<vmem>>, vector<2x1xf32>,
    return
  }
}

</mosaic_0001>

<bundles_post_ra>
// kernel: policy_forward.1
= control target key start
LH: loop header
LB: loop body
LE: loop exit
PB: predicated region body
PF: predicated region fallthrough
CT: control target
= control target key end

     0   :  { %vm43_vm0 = vcmask 1043456   ;;  %vm39_vm1 = vcmask 31744   ;;  %v355_v1 = vmov 0.0   ;;  %vm356_vm2 = vmmov 0   ;;  %s535_s0 = inlined_call_operand.vmem [shape: f32[2,4], index: 0, kind: input, shape index: {}]   ;;  %s536_s1 = inlined_call_operand.vmem [shape: f32[4,128], index: 1, kind: input, shape index: {}]   ;;  %s537_s2 = inlined_call_operand.vmem [shape: f32[1,128], index: 2, kind: input, shape index: {}]   ;;  %s538_s3 = inlined_call_operand.vmem [shape: f32[128,130], index: 3, kind: input, shape index: {}]   ;;  %s539_s4 = inlined_call_operand.vmem [shape: f32[1,130], index: 4, kind: input, shape index: {}]   ;;  %s540_s5 = inlined_call_operand.vmem [shape: f32[1,128], index: 5, kind: input, shape index: {}]   ;;  %s541_s6 = inlined_call_operand.<no memory space> [shape: f32[1,1], index: 6, kind: input, shape index: {}]   ;;  %s542_s7 = inlined_call_operand.hbm [shape: f32[2,2], index: 7, kind: output, shape index: {0}]   ;;  %s543_s8 = inlined_call_operand.vmem [shape: f32[2,1], index: 8, kind: output, shape index: {1}]  }
   0x1   :  { %v31_v0 = vld [vmem:[%s536_s1] sm:$0xf]  ;;  %287 = vmatprep.subr.mxu0 %v355_v1  ;;  %289 = vmatprep.mubr.msk.f32.mxu0 %vm356_vm2, %v355_v1  ;;  %v119_v3 = vld [vmem:[%s538_s3 + $0x8] sm:$0xff]  ;;  %v121_v4 = vld [vmem:[%s538_s3 + $0x18] sm:$0xff] }
   0x2   :  { %v30_v2 = vld [vmem:[%s535_s0] sm:$0x3]  ;;  %288 = vmatpush3.msk.msra.mxu0 %vm43_vm0, %v31_v0  ;;  %v292_v5 = vpack.c.bf16 %v121_v4, %v119_v3  ;;  %v120_v7 = vld [vmem:[%s538_s3 + $0x10] sm:$0xff]  ;;  %v123_v8 = vld [vmem:[%s538_s3 + $0x28] sm:$0xff]  ;;  %226 = vmatprep.mubr.f32.mxu1 %v355_v1 }
   0x3   :  { %v118_v6 = vld [vmem:[%s538_s3] sm:$0xff]  ;;  %290 = vmatmul.mubr.msk.f32.vlgmr.msra.gmra.mrb[0].mxu0 %vm39_vm1, %v30_v2  ;;  %v125_v10 = vld [vmem:[%s538_s3 + $0x38] sm:$0xff]  ;;  %v124_v12 = vld [vmem:[%s538_s3 + $0x30] sm:$0xff] }
   0x4   :  { %v294_v9 = vpack.c.bf16 %v120_v7, %v118_v6  ;;  %v122_v11 = vld [vmem:[%s538_s3 + $0x20] sm:$0xff]  ;;  %293 = vmatprep.subr.bf16.mxu1 %v292_v5  ;;  %v296_v13 = vpack.c.bf16 %v125_v10, %v123_v8  ;;  %v127_v14 = vld [vmem:[%s538_s3 + $0x48] sm:$0xff]  ;;  %v129_v15 = vld [vmem:[%s538_s3 + $0x58] sm:$0xff] }
   0x5   :  { %v298_v16 = vpack.c.bf16 %v124_v12, %v122_v11  ;;  %v300_v17 = vpack.c.bf16 %v129_v15, %v127_v14  ;;  %v126_v18 = vld [vmem:[%s538_s3 + $0x40] sm:$0xff]  ;;  %v128_v19 = vld [vmem:[%s538_s3 + $0x50] sm:$0xff]  ;;  %v131_v20 = vld [vmem:[%s538_s3 + $0x68] sm:$0xff] }
   0x6   :  { %295 = vmatpush1.bf16.msra.mxu1 %v294_v9  ;;  %v133_v21 = vld [vmem:[%s538_s3 + $0x78] sm:$0xff]  ;;  %v302_v22 = vpack.c.bf16 %v128_v19, %v126_v18  ;;  %v130_v24 = vld [vmem:[%s538_s3 + $0x60] sm:$0xff]  ;;  %v132_v25 = vld [vmem:[%s538_s3 + $0x70] sm:$0xff] }
   0x7   :  { %297 = vmatprep.subr.bf16.mxu1 %v296_v13  ;;  %v304_v23 = vpack.c.bf16 %v133_v21, %v131_v20  ;;  %v135_v26 = vld [vmem:[%s538_s3 + $0x88] sm:$0xff]  ;;  %v137_v27 = vld [vmem:[%s538_s3 + $0x98] sm:$0xff] }
   0xa   :  { %299 = vmatpush1.bf16.msra.mxu1 %v298_v16 }
   0xb   :  { %301 = vmatprep.subr.bf16.mxu1 %v300_v17 }
   0xc   :  { %15 = vsyncpa [#allocation4], 0  ;;  %v306_v28 = vpack.c.bf16 %v132_v25, %v130_v24  ;;  %v308_v29 = vpack.c.bf16 %v137_v27, %v135_v26  ;;  %v134_v30 = vld [vmem:[%s538_s3 + $0x80] sm:$0xff]  ;;  %v136_v31 = vld [vmem:[%s538_s3 + $0x90] sm:$0xff]  ;;  %v152_v56 = vlaneseq  ;;  %vm233_vm3 = vcmask 9216   ;;  %s357_s29 = smov [#allocation3]  }
   0xd   :  { %v139_v32 = vld [vmem:[%s538_s3 + $0xa8] sm:$0xff]  ;;  %v141_v33 = vld [vmem:[%s538_s3 + $0xb8] sm:$0xff]  ;;  %v310_v34 = vpack.c.bf16 %v136_v31, %v134_v30  ;;  %v138_v36 = vld [vmem:[%s538_s3 + $0xa0] sm:$0xff]  ;;  %vm254_vm4 = vcmask 1041408   ;;  %v259_v7 = vstv %s541_s6  ;;  %vm261_vm5 = vcmask 1024   ;;  %s269_s30 = sshll.u32 %s357_s29, 4  ;;  %s270_s30 = int_to_ptr.vmem [resolvable:$true] %s269_s30 }
   0xe   :  { %303 = vmatpush1.bf16.msra.mxu1 %v302_v22  ;;  %v312_v35 = vpack.c.bf16 %v141_v33, %v139_v32  ;;  %v140_v37 = vld [vmem:[%s538_s3 + $0xb0] sm:$0xff]  ;;  %v143_v38 = vld [vmem:[%s538_s3 + $0xc8] sm:$0xff]  ;;  %v145_v39 = vld [vmem:[%s538_s3 + $0xd8] sm:$0xff]  ;;  %v153_v57 = vshrl.u32 %v152_v56, 7  ;;  %s331_s6 = scalar_lea.vmem %s270_s30, 32  ;;  %p336_p1 = scmp.lt.s32.totalorder %s270_s30, %s270_s30 }
   0xf   :  { %305 = vmatprep.subr.bf16.mxu1 %v304_v23  ;;  %v314_v40 = vpack.c.bf16 %v140_v37, %v138_v36  ;;  %v316_v41 = vpack.c.bf16 %v145_v39, %v143_v38  ;;  %v142_v42 = vld [vmem:[%s538_s3 + $0xc0] sm:$0xff]  ;;  %v144_v43 = vld [vmem:[%s538_s3 + $0xd0] sm:$0xff]  ;;  %v147_v45 = vld [vmem:[%s538_s3 + $0xe8] sm:$0xff]  ;;  %p332_p0 = scmp.ne.s32.totalorder %s270_s30, %s331_s6  ;;  %p337_p2 = scmp.lt.s32.totalorder %s331_s6, %s331_s6 }
  0x10   :  { %v318_v44 = vpack.c.bf16 %v144_v43, %v142_v42  ;;  %v149_v46 = vld [vmem:[%s538_s3 + $0xf8] sm:$0xff]  ;;  %v146_v48 = vld [vmem:[%s538_s3 + $0xe0] sm:$0xff]  ;;  %v148_v49 = vld [vmem:[%s538_s3 + $0xf0] sm:$0xff]  ;;  %v154_v58 = vsub.s32 0, %v153_v57  ;;  %v158_v60 = vsub.s32 1, %v153_v57 }
  0x11   :  { %v320_v47 = vpack.c.bf16 %v149_v46, %v147_v45  ;;  %v322_v50 = vpack.c.bf16 %v148_v49, %v146_v48  ;;  %v281_v51 = vld [vmem:[%s537_s2] ss:$0 sm:$0xff]  ;;  %p338_p3 = por %p337_p2, %p336_p1 }
  0x12   :  { %307 = vmatpush1.bf16.msra.mxu1 %v306_v28  ;;  %v150_v59 = vld [vmem:[%s539_s4] sm:$0x3] }
  0x13   :  { %309 = vmatprep.subr.bf16.mxu1 %v308_v29  ;;  %v155_v61 = vrot.slane %v150_v59, %v154_v58  ;;  %v159_v62 = vrot.slane %v150_v59, %v158_v60  ;;  %v284_v0 = vld [vmem:[%s540_s5] ss:$0 sm:$0xff]  ;;  %p339_p4 = pnand %p338_p3, %p332_p0 }
  0x16   :  { %311 = vmatpush1.bf16.msra.mxu1 %v310_v34 }
  0x17   :  { %313 = vmatprep.subr.bf16.mxu1 %v312_v35 }
  0x1a   :  { %315 = vmatpush1.bf16.msra.mxu1 %v314_v40 }
  0x1b   :  { %317 = vmatprep.subr.bf16.mxu1 %v316_v41 }
  0x1e   :  { %319 = vmatpush1.bf16.msra.mxu1 %v318_v44 }
  0x1f   :  { %321 = vmatprep.subr.bf16.mxu1 %v320_v47 }
  0x22   :  { %323 = vmatpush1.bf16.msra.mxu1 %v322_v50 }
  0xd6   :  { %v113_v52 = vpop.f32.mrb[0].mxu0 }
  0xd7   :  { %v114_v53 = vadd.f32 %v281_v51, %v113_v52  ;;  %v291_v54 = vpop.f32.mrb[1].mxu0 }
  0xd9   :  { %v117_v55 = vmax.f32 %v114_v53, 0.0 }
  0xdb   :  { %227 = vmatmul.mubr.f32.vlgmr.msra.gmra.mrb[0].mxu1 %v117_v55 }
 0x1ae   :  { %v228_v63 = vpop.f32.mrb[0].mxu1 }
 0x1af   :  { %v229_v1 = vadd.f32 %v228_v63, %v155_v61  ;;  %v230_v2 = vpop.f32.mrb[1].mxu1 }
 0x1b0   :  { %v231_v3 = vadd.f32 %v230_v2, %v159_v62 }
 0x1b1   :  { %v253_v4 = vmul.f32 %v284_v0, %v229_v1 }
 0x1b2   :  { %v234_v5 = vsel %vm233_vm3, %v231_v3, -inf }
 0x1b3   :  { %235 = vmax.xlane.f32.xlu0 %v234_v5  ;;  %v255_v6 = vsel %vm254_vm4, %v253_v4, 0.0 }
 0x1b4   :  { %256 = vadd.xlane.f32.xlu1 %v255_v6 }
 0x240   :  { %v236_v8 = vpop.xlane.xlu0 %235 }
 0x241   :  { %v237_v9 = vsub.f32 %v231_v3, %v236_v8  ;;  %v257_v10 = vpop.xlane.xlu1 %256 }
 0x242   :  { %v260_v11 = vadd.f32 %v259_v7, %v257_v10 }
 0x243   :  { %v238_v12 = vmul.f32 1.442695, %v237_v9 }
 0x244   :  { %262 = vst.msk [vmem:[%s543_s8] sm:$0x3] %vm261_vm5, %v260_v11 }
 0x245   :  { %327 = vpow2.f32 %v238_v12 }
 0x24f   :  { %v328_v13 = vpop.eup %327 }
 0x250   :  { %v240_v14 = vsel %vm233_vm3, %v328_v13, 0.0 }
 0x251   :  { %241 = vadd.xlane.f32.xlu0 %v240_v14 }
 0x2de   :  { %v242_v15 = vpop.xlane.xlu0 %241 }
 0x2df   :  { %329 = vrcp.f32 %v242_v15 }
 0x2e9   :  { %v330_v16 = vpop.eup %329 }
 0x2ea   :  { %v244_v17 = vmul.f32 %v330_v16, %v328_v13 }
 0x2ec   :  { %245 = vst.msk [vmem:[#allocation3] sm:$0x3] %vm233_vm3, %v244_v17 }
 0x2ed   :  { %342 = shalt.err (!%p339_p4)
}
 0x2ee   :  { %s343_s10 = scalar_lea.hbm %s542_s7, 32 }
 0x2ef   :  { %p344_p5 = scmp.ne.s32.totalorder %s542_s7, %s343_s10  ;;  %p347_p6 = scmp.lt.u32.totalorder %s343_s10, %s542_s7 }
 0x2f1   :  { %p349_p7 = pnand %p347_p6, %p344_p5 }
 0x2f3   :  { %352 = shalt.err (!%p349_p7)
}
 0x2f4   :  { %272 = dma.vmem_to_hbm [thread:$0]  %s270_s30, 32, %s542_s7, [#allocation4]  }
 0x2f5   :  { %353 = dma.done.wait [#allocation4], 32  }
 0x2f6   :  { %354 = vsyncadd [#allocation4], 4294967264 }
 0x2f7   :  { %280 = vsyncpa [#allocation4], 1 }

</bundles_post_ra>
